<compile_context>
chip_gen: v6e
topology: v6e:2x2x1
jax: 0.10.0
libtpu: 0.0.40
codegen_flags: <defaults>
</compile_context>

<pallas_src>
import functools

import jax
import jax.numpy as jnp
from jax.experimental import pallas as pl
from jax.experimental.pallas import tpu as pltpu


def _round_up(x, m):
    return (x + m - 1) // m * m


def _vmem_capacity_bytes():
    try:
        return int(pltpu.get_tpu_info().vmem_capacity_bytes)
    except Exception:
        return 64 << 20  # conservative (v7x per-TC size); safe on v5e/v6e too


def _plan_tiles(b, c, d, in_itemsize):
    """Pick batch tile + scoped-VMEM limit from the real per-generation VMEM size."""
    vmem_cap = _vmem_capacity_bytes()
    budget = int(0.6 * vmem_cap)
    # Per batch-row footprint:
    #   * double-buffered input tiles at their real dtype (+ int32 label column),
    #   * ~8 full-width f32 logit temporaries and ~4 token temporaries in-kernel.
    per_row = (2 * (in_itemsize * (2 * c + 2 * d) + 4)
               + 4 * (8 * c + 4 * d))
    tile = budget // per_row
    tile = max(8, min((tile // 8) * 8, 2048))
    # Guarantee >=2 grid steps when B allows it so the "parallel" batch axis can
    # span both v7x TensorCores (no-op on single-TC v5e/v6e).
    tile = min(tile, max(8, _round_up(-(-b // 2), 8)))
    tile = min(tile, _round_up(b, 8))
    num_tiles = -(-b // tile)
    # Scoped VMEM limit: real working set + headroom, capped below physical VMEM.
    working = per_row * tile + (1 << 20)
    vmem_limit = int(min(int(0.9 * vmem_cap), max(working, 16 << 20)))
    return tile, num_tiles, vmem_limit


def _ens_loss_kernel(lab_ref, stu_tok_ref, tea_tok_ref, stu_log_ref, tea_log_ref,
                     part_ref, *, tau, batch, tile_b):
    """Per-batch-tile partial sums [sum_sqdiff, sum_CE, sum_KL] -> lanes 0..2."""
    row_start = pl.program_id(0) * tile_b
    row_ids = jax.lax.broadcasted_iota(jnp.int32, (tile_b, 1), 0) + row_start
    row_valid = row_ids < batch  # masks the ragged last tile (stale rows in VMEM)

    # ---- token loss partial: sum((stu_token - tea_token)^2) over valid rows ----
    st = stu_tok_ref[...].astype(jnp.float32)
    tt = tea_tok_ref[...].astype(jnp.float32)
    diff = jnp.where(row_valid, st - tt, 0.0)
    sq_sum = jnp.sum(diff * diff)

    # ---- logits ----
    s = stu_log_ref[...].astype(jnp.float32)      # (tile_b, C)
    t = tea_log_ref[...].astype(jnp.float32)      # (tile_b, C)
    lab = lab_ref[...]                            # (tile_b, 1) int32
    inv_tau = jnp.float32(1.0 / tau)

    # base_criterion (CrossEntropyLoss): CE(row) = logsumexp(s) - s[label];
    # built from row reductions only, no full log-softmax matrix.
    m_s = jnp.max(s, axis=1, keepdims=True)
    z_s = s - m_s
    lse_s = m_s + jnp.log(jnp.sum(jnp.exp(z_s), axis=1, keepdims=True))
    cls_idx = jax.lax.broadcasted_iota(jnp.int32, s.shape, 1)
    s_lab = jnp.sum(jnp.where(cls_idx == lab, s, 0.0), axis=1, keepdims=True)
    ce_sum = jnp.sum(jnp.where(row_valid, lse_s - s_lab, 0.0))

    # Soft distillation, p_t = softmax(t/tau):
    #   KL(row) = sum_c p_t*z_tT - log(sum e_tT) - sum_c p_t*z_sT + log(sum e_sT)
    # (no t_lsT / s_lsT / p_t matrices materialized).  Student row max is reused
    # for the tempered softmax since max(s/tau) = max(s)/tau for tau > 0.
    z_sT = z_s * inv_tau
    log_sum_sT = jnp.log(jnp.sum(jnp.exp(z_sT), axis=1, keepdims=True))

    m_t = jnp.max(t, axis=1, keepdims=True)
    z_tT = (t - m_t) * inv_tau
    e_tT = jnp.exp(z_tT)
    sum_tT = jnp.sum(e_tT, axis=1, keepdims=True)
    tz = jnp.sum(e_tT * z_tT, axis=1, keepdims=True) / sum_tT
    sz = jnp.sum(e_tT * z_sT, axis=1, keepdims=True) / sum_tT
    kl_rows = tz - jnp.log(sum_tT) - sz + log_sum_sT
    kl_sum = jnp.sum(jnp.where(row_valid, kl_rows, 0.0))

    # ---- pack the three partial sums into one lane-dense (1,1,128) store ----
    lane = jax.lax.broadcasted_iota(jnp.int32, (1, 128), 1)
    vec = jnp.where(lane == 0, sq_sum,
          jnp.where(lane == 1, ce_sum,
          jnp.where(lane == 2, kl_sum, 0.0)))
    part_ref[...] = vec.reshape(1, 1, 128)


def ens_loss(stu_token, tea_token, stu_logits, tea_logits, labels,
             *, alpha=0.5, tau=2.0):
    """Returns (token_loss, cls_loss) matching EnsLoss.forward 'vit'/'soft'/'mse'."""
    B, C = stu_logits.shape
    _, D = stu_token.shape

    in_itemsize = max(stu_logits.dtype.itemsize, stu_token.dtype.itemsize)
    tile_b, num_tiles, vmem_limit = _plan_tiles(B, C, D, in_itemsize)

    labels2d = labels.astype(jnp.int32).reshape(B, 1)

    kernel = functools.partial(_ens_loss_kernel, tau=float(tau),
                               batch=B, tile_b=tile_b)

    in_bytes = in_itemsize * B * (2 * C + 2 * D) + 4 * B
    cost = pl.CostEstimate(flops=B * (10 * C + 3 * D),
                           transcendentals=3 * B * C,
                           bytes_accessed=in_bytes + num_tiles * 512)

    partials = pl.pallas_call(
        kernel,
        out_shape=jax.ShapeDtypeStruct((num_tiles, 1, 128), jnp.float32),
        grid_spec=pltpu.PrefetchScalarGridSpec(
            num_scalar_prefetch=0,
            grid=(num_tiles,),
            in_specs=[pl.BlockSpec((tile_b, 1), lambda i: (i, 0)),
                      pl.BlockSpec((tile_b, D), lambda i: (i, 0)),
                      pl.BlockSpec((tile_b, D), lambda i: (i, 0)),
                      pl.BlockSpec((tile_b, C), lambda i: (i, 0)),
                      pl.BlockSpec((tile_b, C), lambda i: (i, 0))],
            out_specs=pl.BlockSpec((1, 1, 128), lambda i: (i, 0, 0)),
        ),
        compiler_params=pltpu.CompilerParams(
            dimension_semantics=("parallel",),
            vmem_limit_bytes=vmem_limit),
        cost_estimate=cost,
    )(labels2d, stu_token, tea_token, stu_logits, tea_logits)

    sums = jnp.sum(partials[:, 0, :], axis=0)      # (128,)
    sq_sum, ce_sum, kl_sum = sums[0], sums[1], sums[2]

    token_loss = sq_sum / jnp.float32(B * D)                      # nn.MSELoss (mean)
    ce = ce_sum / jnp.float32(B)                                  # CrossEntropyLoss (mean)
    kl = kl_sum * jnp.float32(tau * tau) / jnp.float32(B * C)     # kl_div 'sum' * T^2 / numel
    cls_loss = (1.0 - alpha) * ce + alpha * kl
    return token_loss, cls_loss


def _reference(stu_token, tea_token, stu_logits, tea_logits, labels, alpha, tau):
    token_loss = jnp.mean((stu_token - tea_token) ** 2)
    ls = jax.nn.log_softmax(stu_logits, axis=1)
    ce = -jnp.mean(jnp.take_along_axis(ls, labels[:, None], axis=1))
    s_ls = jax.nn.log_softmax(stu_logits / tau, axis=1)
    t_ls = jax.nn.log_softmax(tea_logits / tau, axis=1)
    kl = jnp.sum(jnp.exp(t_ls) * (t_ls - s_ls)) * (tau * tau) / stu_logits.size
    cls_loss = (1 - alpha) * ce + alpha * kl
    return token_loss, cls_loss


if __name__ == "__main__":
    key = jax.random.PRNGKey(0)
    k1, k2, k3, k4, k5 = jax.random.split(key, 5)

    # B=20 deliberately not a multiple of the batch tile -> exercises the ragged
    # last tile (in-kernel row mask) and the >=2-tile (megacore) path.
    B, C, D = 20, 10, 32        # batch, num_classes, token dim
    alpha, tau = 0.5, 2.0

    stu_token = jax.random.normal(k1, (B, D), dtype=jnp.float32)
    tea_token = jax.random.normal(k2, (B, D), dtype=jnp.float32)   # synthetic teacher last_tokens
    stu_logits = jax.random.normal(k3, (B, C), dtype=jnp.float32)
    tea_logits = jax.random.normal(k4, (B, C), dtype=jnp.float32)  # synthetic teacher output
    labels = jax.random.randint(k5, (B,), 0, C, dtype=jnp.int32)

    token_loss, cls_loss = ens_loss(stu_token, tea_token, stu_logits, tea_logits,
                                    labels, alpha=alpha, tau=tau)
    jax.block_until_ready((token_loss, cls_loss))

    ref_tok, ref_cls = _reference(stu_token, tea_token, stu_logits, tea_logits,
                                  labels, alpha, tau)
    assert jnp.allclose(token_loss, ref_tok, rtol=1e-5, atol=1e-5), (token_loss, ref_tok)
    assert jnp.allclose(cls_loss, ref_cls, rtol=1e-5, atol=1e-5), (cls_loss, ref_cls)

    print("KERNEL_OK")
</pallas_src>

<mosaic_0001>
module attributes {stable_mosaic.version = 11 : i64} {
  func.func @_ens_loss_kernel(%arg0: i32, %arg1: memref<16x1xi32, #tpu.memory_space<vmem>>, %arg2: memref<16x32xf32, #tpu.memory_space<vmem>>, %arg3: memref<16x32xf32, #tpu.memory_space<vmem>>, %arg4: memref<16x10xf32, #tpu.memory_space<vmem>>, %arg5: memref<16x10xf32, #tpu.memory_space<vmem>>, %arg6: memref<1x1x128xf32, #tpu.memory_space<vmem>>) attributes {dimension_semantics = [#tpu.dimension_semantics<parallel>], iteration_bounds = array<i64: 2>, scalar_prefetch = 0 : i64, scratch_operands = 0 : i64, tpu.core_type = #tpu.core_type<tc>, window_params = [{transform_indices = @transform_0, window_bounds = array<i64: 16, 1>}, {transform_indices = @transform_1, window_bounds = array<i64: 16, 32>}, {transform_indices = @transform_2, window_bounds = array<i64: 16, 32>}, {transform_indices = @transform_3, window_bounds = array<i64: 16, 10>}, {transform_indices = @transform_4, window_bounds = array<i64: 16, 10>}, {transform_indices = @transform_5, window_bounds = array<i64: 1, 1, 128>}]} {
    %c16_i32 = arith.constant 16 : i32
    %0 = arith.muli %arg0, %c16_i32 : i32
    %1 = tpu.iota {dimensions = array<i32: 0>} : vector<16x1xi32>
    %2 = vector.broadcast %0 : i32 to vector<16x1xi32>
    %3 = arith.addi %1, %2 : vector<16x1xi32>
    %c20_i32 = arith.constant 20 : i32
    %4 = vector.broadcast %c20_i32 : i32 to vector<16x1xi32>
    %5 = arith.cmpi slt, %3, %4 : vector<16x1xi32>
    %c0 = arith.constant 0 : index
    %c0_0 = arith.constant 0 : index
    %6 = vector.load %arg2[%c0, %c0_0] : memref<16x32xf32, #tpu.memory_space<vmem>>, vector<16x32xf32>
    %c0_1 = arith.constant 0 : index
    %c0_2 = arith.constant 0 : index
    %7 = vector.load %arg3[%c0_1, %c0_2] : memref<16x32xf32, #tpu.memory_space<vmem>>, vector<16x32xf32>
    %8 = arith.subf %6, %7 : vector<16x32xf32>
    %cst = arith.constant 0.000000e+00 : f32
    %9 = vector.shape_cast %5 : vector<16x1xi1> to vector<16x1xi1>
    %10 = vector.broadcast %9 : vector<16x1xi1> to vector<16x32xi1>
    %11 = vector.broadcast %cst : f32 to vector<16x32xf32>
    %12 = arith.select %10, %8, %11 : vector<16x32xi1>, vector<16x32xf32>
    %13 = arith.mulf %12, %12 : vector<16x32xf32>
    %14 = vector.shape_cast %13 : vector<16x32xf32> to vector<1x16x32xf32>
    %cst_3 = arith.constant dense<0.000000e+00> : vector<1xf32>
    %15 = vector.multi_reduction <add>, %14, %cst_3 [1, 2] : vector<1x16x32xf32> to vector<1xf32>
    %16 = vector.shape_cast %15 : vector<1xf32> to vector<1x1x1xf32>
    %17 = vector.extract %16[0, 0, 0] : f32 from vector<1x1x1xf32>
    %c0_4 = arith.constant 0 : index
    %c0_5 = arith.constant 0 : index
    %18 = vector.load %arg4[%c0_4, %c0_5] : memref<16x10xf32, #tpu.memory_space<vmem>>, vector<16x10xf32>
    %c0_6 = arith.constant 0 : index
    %c0_7 = arith.constant 0 : index
    %19 = vector.load %arg5[%c0_6, %c0_7] : memref<16x10xf32, #tpu.memory_space<vmem>>, vector<16x10xf32>
    %c0_8 = arith.constant 0 : index
    %c0_9 = arith.constant 0 : index
    %20 = vector.load %arg1[%c0_8, %c0_9] : memref<16x1xi32, #tpu.memory_space<vmem>>, vector<16x1xi32>
    %cst_10 = arith.constant dense<0xFF800000> : vector<16xf32>
    %21 = vector.multi_reduction <maximumf>, %18, %cst_10 [1] : vector<16x10xf32> to vector<16xf32>
    %22 = vector.shape_cast %21 : vector<16xf32> to vector<16x1xf32>
    %23 = vector.broadcast %22 : vector<16x1xf32> to vector<16x10xf32>
    %24 = arith.subf %18, %23 : vector<16x10xf32>
    %25 = math.exp %24 : vector<16x10xf32>
    %cst_11 = arith.constant dense<0.000000e+00> : vector<16xf32>
    %26 = vector.multi_reduction <add>, %25, %cst_11 [1] : vector<16x10xf32> to vector<16xf32>
    %27 = vector.shape_cast %26 : vector<16xf32> to vector<16x1xf32>
    %28 = math.log %27 : vector<16x1xf32>
    %29 = arith.addf %22, %28 : vector<16x1xf32>
    %30 = tpu.iota {dimensions = array<i32: 1>} : vector<16x10xi32>
    %31 = vector.broadcast %20 : vector<16x1xi32> to vector<16x10xi32>
    %32 = arith.cmpi eq, %30, %31 : vector<16x10xi32>
    %cst_12 = arith.constant 0.000000e+00 : f32
    %33 = vector.broadcast %cst_12 : f32 to vector<16x10xf32>
    %34 = arith.select %32, %18, %33 : vector<16x10xi1>, vector<16x10xf32>
    %cst_13 = arith.constant dense<0.000000e+00> : vector<16xf32>
    %35 = vector.multi_reduction <add>, %34, %cst_13 [1] : vector<16x10xf32> to vector<16xf32>
    %36 = vector.shape_cast %35 : vector<16xf32> to vector<16x1xf32>
    %37 = arith.subf %29, %36 : vector<16x1xf32>
    %cst_14 = arith.constant 0.000000e+00 : f32
    %38 = vector.broadcast %cst_14 : f32 to vector<16x1xf32>
    %39 = arith.select %5, %37, %38 : vector<16x1xi1>, vector<16x1xf32>
    %40 = vector.shape_cast %39 : vector<16x1xf32> to vector<1x16x1xf32>
    %cst_15 = arith.constant dense<0.000000e+00> : vector<1xf32>
    %41 = vector.multi_reduction <add>, %40, %cst_15 [1, 2] : vector<1x16x1xf32> to vector<1xf32>
    %42 = vector.shape_cast %41 : vector<1xf32> to vector<1x1x1xf32>
    %43 = vector.extract %42[0, 0, 0] : f32 from vector<1x1x1xf32>
    %cst_16 = arith.constant 5.000000e-01 : f32
    %44 = vector.broadcast %cst_16 : f32 to vector<16x10xf32>
    %45 = arith.mulf %24, %44 : vector<16x10xf32>
    %46 = math.exp %45 : vector<16x10xf32>
    %cst_17 = arith.constant dense<0.000000e+00> : vector<16xf32>
    %47 = vector.multi_reduction <add>, %46, %cst_17 [1] : vector<16x10xf32> to vector<16xf32>
    %48 = vector.shape_cast %47 : vector<16xf32> to vector<16x1xf32>
    %49 = math.log %48 : vector<16x1xf32>
    %cst_18 = arith.constant dense<0xFF800000> : vector<16xf32>
    %50 = vector.multi_reduction <maximumf>, %19, %cst_18 [1] : vector<16x10xf32> to vector<16xf32>
    %51 = vector.shape_cast %50 : vector<16xf32> to vector<16x1xf32>
    %52 = vector.broadcast %51 : vector<16x1xf32> to vector<16x10xf32>
    %53 = arith.subf %19, %52 : vector<16x10xf32>
    %cst_19 = arith.constant 5.000000e-01 : f32
    %54 = vector.broadcast %cst_19 : f32 to vector<16x10xf32>
    %55 = arith.mulf %53, %54 : vector<16x10xf32>
    %56 = math.exp %55 : vector<16x10xf32>
    %cst_20 = arith.constant dense<0.000000e+00> : vector<16xf32>
    %57 = vector.multi_reduction <add>, %56, %cst_20 [1] : vector<16x10xf32> to vector<16xf32>
    %58 = vector.shape_cast %57 : vector<16xf32> to vector<16x1xf32>
    %59 = arith.mulf %56, %55 : vector<16x10xf32>
    %cst_21 = arith.constant dense<0.000000e+00> : vector<16xf32>
    %60 = vector.multi_reduction <add>, %59, %cst_21 [1] : vector<16x10xf32> to vector<16xf32>
    %61 = vector.shape_cast %60 : vector<16xf32> to vector<16x1xf32>
    %62 = arith.divf %61, %58 : vector<16x1xf32>
    %63 = arith.mulf %56, %45 : vector<16x10xf32>
    %cst_22 = arith.constant dense<0.000000e+00> : vector<16xf32>
    %64 = vector.multi_reduction <add>, %63, %cst_22 [1] : vector<16x10xf32> to vector<16xf32>
    %65 = vector.shape_cast %64 : vector<16xf32> to vector<16x1xf32>
    %66 = arith.divf %65, %58 : vector<16x1xf32>
    %67 = math.log %58 : vector<16x1xf32>
    %68 = arith.subf %62, %67 : vector<16x1xf32>
    %69 = arith.subf %68, %66 : vector<16x1xf32>
    %70 = arith.addf %69, %49 : vector<16x1xf32>
    %cst_23 = arith.constant 0.000000e+00 : f32
    %71 = vector.broadcast %cst_23 : f32 to vector<16x1xf32>
    %72 = arith.select %5, %70, %71 : vector<16x1xi1>, vector<16x1xf32>
    %73 = vector.shape_cast %72 : vector<16x1xf32> to vector<1x16x1xf32>
    %cst_24 = arith.constant dense<0.000000e+00> : vector<1xf32>
    %74 = vector.multi_reduction <add>, %73, %cst_24 [1, 2] : vector<1x16x1xf32> to vector<1xf32>
    %75 = vector.shape_cast %74 : vector<1xf32> to vector<1x1x1xf32>
    %76 = vector.extract %75[0, 0, 0] : f32 from vector<1x1x1xf32>
    %77 = tpu.iota {dimensions = array<i32: 1>} : vector<1x128xi32>
    %c0_i32 = arith.constant 0 : i32
    %78 = vector.broadcast %c0_i32 : i32 to vector<1x128xi32>
    %79 = arith.cmpi eq, %77, %78 : vector<1x128xi32>
    %c1_i32 = arith.constant 1 : i32
    %80 = vector.broadcast %c1_i32 : i32 to vector<1x128xi32>
    %81 = arith.cmpi eq, %77, %80 : vector<1x128xi32>
    %c2_i32 = arith.constant 2 : i32
    %82 = vector.broadcast %c2_i32 : i32 to vector<1x128xi32>
    %83 = arith.cmpi eq, %77, %82 : vector<1x128xi32>
    %cst_25 = arith.constant 0.000000e+00 : f32
    %84 = vector.broadcast %76 : f32 to vector<1x128xf32>
    %85 = vector.broadcast %cst_25 : f32 to vector<1x128xf32>
    %86 = arith.select %83, %84, %85 : vector<1x128xi1>, vector<1x128xf32>
    %87 = vector.broadcast %43 : f32 to vector<1x128xf32>
    %88 = arith.select %81, %87, %86 : vector<1x128xi1>, vector<1x128xf32>
    %89 = vector.broadcast %17 : f32 to vector<1x128xf32>
    %90 = arith.select %79, %89, %88 : vector<1x128xi1>, vector<1x128xf32>
    %91 = vector.shape_cast %90 : vector<1x128xf32> to vector<1x1x128xf32>
    %c0_26 = arith.constant 0 : index
    %c0_27 = arith.constant 0 : index
    %c0_28 = arith.constant 0 : index
    %92 = vector.load %arg6[%c0_26, %c0_27, %c0_28] : memref<1x1x128xf32, #tpu.memory_space<vmem>>, vector<1x1x128xf32>
    tpu.vector_store %arg6[%c0_26, %c0_27, %c0_28], %91 {strides = array<i32>} : memref<1x1x128xf32, #tpu.memory_space<vmem>>, vector<1x1x128xf32>,
    return
  }
  func.func @transform_0(%arg0: i32) -> (i32, i32) {
    %c0_i32 = arith.constant 0 : i32
    %c0_i32_0 = arith.constant 0 : i32
    return %arg0, %c0_i32 : i32, i32
  }
  func.func @transform_1(%arg0: i32) -> (i32, i32) {
    %c0_i32 = arith.constant 0 : i32
    %c0_i32_0 = arith.constant 0 : i32
    return %arg0, %c0_i32 : i32, i32
  }
  func.func @transform_2(%arg0: i32) -> (i32, i32) {
    %c0_i32 = arith.constant 0 : i32
    %c0_i32_0 = arith.constant 0 : i32
    return %arg0, %c0_i32 : i32, i32
  }
  func.func @transform_3(%arg0: i32) -> (i32, i32) {
    %c0_i32 = arith.constant 0 : i32
    %c0_i32_0 = arith.constant 0 : i32
    return %arg0, %c0_i32 : i32, i32
  }
  func.func @transform_4(%arg0: i32) -> (i32, i32) {
    %c0_i32 = arith.constant 0 : i32
    %c0_i32_0 = arith.constant 0 : i32
    return %arg0, %c0_i32 : i32, i32
  }
  func.func @transform_5(%arg0: i32) -> (i32, i32, i32) {
    %c0_i32 = arith.constant 0 : i32
    %c0_i32_0 = arith.constant 0 : i32
    %c0_i32_1 = arith.constant 0 : i32
    return %arg0, %c0_i32, %c0_i32_0 : i32, i32, i32
  }
}

</mosaic_0001>

<bundles_post_ra>
// kernel: tpu_custom_call.1
= control target key start
LH: loop header
LB: loop body
LE: loop exit
PB: predicated region body
PF: predicated region fallthrough
CT: control target
= control target key end

     0   :  { %10 = vsyncpa [#allocation3], 0  ;;  %s1079_s0 = inlined_call_operand.vmem [shape: s32[20,1], index: 0, kind: input, shape index: {}]   ;;  %s1080_s1 = inlined_call_operand.vmem [shape: f32[20,32], index: 1, kind: input, shape index: {}]   ;;  %s1081_s2 = inlined_call_operand.vmem [shape: f32[20,32], index: 2, kind: input, shape index: {}]   ;;  %s1082_s3 = inlined_call_operand.vmem [shape: f32[20,10], index: 3, kind: input, shape index: {}]   ;;  %s1083_s4 = inlined_call_operand.vmem [shape: f32[20,10], index: 4, kind: input, shape index: {}]   ;;  %s1084_s5 = inlined_call_operand.hbm [shape: f32[2,1,128], index: 5, kind: output, shape index: {}]  }
   0x1   :  { %12 = vsyncpa [#allocation3 + $0x1], 0  ;;  %s910_s18 = smov 0   ;;  %s912_s19 = smov 0  }
   0x2   :  { %s914_s20 = smov 0   ;;  %s916_s21 = smov 0  }
   0x3 LB: > { %s931_s22 = sadd.s32 4294967295, %s876_s21   ;;  %s722_s23 = sadd.s32 4294967294, %s876_s21   ;;  %s876_s21 = sphi %s916_s21, %s1090_s21   ;;  %s872_s20 = sphi %s914_s20, %s1089_s20   ;;  %s868_s19 = sphi %s912_s19, %s1088_s19   ;;  %s864_s18 = sphi %s910_s18, %s1087_s18  }
   0x4   : > { %s935_s24 = sadd.s32 1, %s876_s21   ;;  %s155_s25 = sadd.s32 1, %s872_s20 }
   0x5   : > { %s152_s26 = ssub.s32 %s876_s21, %s935_s24  ;;  %p165_p0 = scmp.ne.s32.totalorder %s872_s20, %s868_s19 }
   0x6   : > { %p153_p1 = scmp.eq.s32.totalorder %s152_s26, 0  ;;  %p166_p2 = scmp.eq.s32.totalorder %s931_s22, 1 }
   0x7   : > { %p171_p3 = scmp.ne.s32.totalorder %s868_s19, %s864_s18  ;;  %p172_p4 = scmp.eq.s32.totalorder %s722_s23, 1 }
   0x8   : > { %s946_s27 = scalar_select %p153_p1, %s872_s20, %s155_s25  }
   0x9   : > { %p948_p5 = por %p166_p2, %p165_p0  ;;  %p952_p6 = por %p172_p4, %p171_p3 }
   0xa   : > { %p725_p7 = scmp.ge.s32.totalorder %s876_s21, 1  ;;  %p275_p8 = scmp.lt.s32.totalorder %s876_s21, 3 }
   0xc   : > { %p276_p9 = pnand %p725_p7, %p275_p8 }
   0xd   : > { %s726_s30 = sshll.u32 (!%p276_p9), %s931_s22, 1  ;;  %s736_s16 = sshll.u32 (!%p276_p9), %s931_s22, 4 }
   0xe   : > { %279 = sbr.rel (%p276_p9) target bundleno = 577 (0x241), region = 40  ;;  %p347_p10 = scmp.lt.s32.totalorder (!%p276_p9), %s726_s30, 2 }
  0x13   : > { %v878_v0 = vmov 0   ;;  %s1092_s30 = smov (!%p347_p10, %s726_s30), 2  ;;  %vm454_vm0 = vcmask 80896   ;;  %v413_v29 = vlaneseq  ;;  %v416_v59 = vstv %s736_s16 }
  0x14   : > { %786 = vset.pattern.permute.xlu0 %v878_v0  ;;  %787 = vset.pattern.permute.xlu1 %v878_v0  ;;  %s959_s6 = sshll.u32 %s1092_s30, 3  ;;  %vm435_vm5 = vcmask 261120   ;;  %vm501_vm6 = vcmask 7168  }
  0x15   : > { %s406_s9 = scalar_lea.vmem %s1083_s4, %s959_s6  ;;  %s392_s12 = scalar_lea.vmem %s1082_s3, %s959_s6  ;;  %v988_v33 = vand.u32 127, %v413_v29  ;;  %v414_v55 = vshrl.u32 %v413_v29, 7 }
  0x16   : > { %v450_v1 = vld [vmem:[%s406_s9] sm:$0xff]  ;;  %v451_v2 = vld [vmem:[%s406_s9 + $0x8] sm:$0xff]  ;;  %s350_s15 = scalar_lea.vmem %s1079_s0, %s959_s6  ;;  %s364_s25 = scalar_lea.vmem %s1080_s1, %s959_s6 }
  0x17   : > { %v448_v3 = vld [vmem:[%s392_s12] sm:$0xff]  ;;  %v530_v4 = vsel %vm454_vm0, %v450_v1, -inf  ;;  %v971_v6 = vld [vmem:[%s392_s12 + $0x8] sm:$0xff]  ;;  %v533_v7 = vsel %vm454_vm0, %v451_v2, -inf  ;;  %v415_v57 = vadd.s32 8, %v414_v55  ;;  %s378_s7 = scalar_lea.vmem %s1081_s2, %s959_s6  ;;  %v1015_v60 = vadd.s32 %v416_v59, %v414_v55  ;;  %s340_s6 = sand.u32 1, %s868_s19  }
  0x18   : > { %v455_v5 = vsel %vm454_vm0, %v448_v3, -inf  ;;  %531 = vmax.xlane.f32.xlu0 %v530_v4  ;;  %v458_v8 = vsel %vm454_vm0, %v971_v6, -inf  ;;  %v453_v9 = vld [vmem:[%s350_s15 + $0x8] sm:$0xff]  ;;  %v452_v10 = vld [vmem:[%s350_s15] sm:$0xff]  ;;  %vm598_vm7 = vcmp.eq.s32.totalorder %v988_v33, 2  ;;  %vm597_vm8 = vcmp.eq.s32.totalorder %v988_v33, 1  ;;  %s1044_s15 = scalar_lea.hbm %s1084_s5, %s736_s16 }
  0x19   : > { %456 = vmax.xlane.f32.xlu1 %v455_v5  ;;  %v1017_v61 = vadd.s32 %v416_v59, %v415_v57  ;;  %v421_v62 = vld [vmem:[%s364_s25] sm:$0xff]  ;;  %v422_v63 = vld [vmem:[%s364_s25 + $0x8] sm:$0xff]  ;;  %vm419_vm3 = vcmp.lt.s32.totalorder %v1015_v60, 20  ;;  %s341_s11 = scalar_lea.vmem [#allocation2], %s340_s6  ;;  %vm596_vm9 = vcmp.eq.s32.totalorder %v988_v33, 0  ;;  %s607_s17 = scalar_lea.sflag [#allocation3], %s340_s6 }
  0x1a   : > { %v423_v0 = vld [vmem:[%s378_s7] sm:$0xff]  ;;  %s619_s12 = sshll.u32 %s341_s11, 4  ;;  %s879_s25 = smov [#allocation2]   ;;  %s620_s12 = int_to_ptr.vmem [resolvable:$true] %s619_s12 }
  0x1b   : > { %vm420_vm4 = vcmp.lt.s32.totalorder %v1017_v61, 20  ;;  %s816_s23 = scalar_lea.vmem %s620_s12, 16  ;;  %s820_s26 = sshll.u32 %s879_s25, 4  ;;  %s821_s26 = int_to_ptr.vmem [resolvable:$false] %s820_s26 }
  0x1c   : > { %534 = vmax.xlane.f32.xlu0 %v533_v7  ;;  %p817_p11 = scmp.ne.s32.totalorder %s620_s12, %s816_s23  ;;  %s822_s30 = scalar_lea.vmem %s821_s26, 32 }
  0x1d   : > { %459 = vmax.xlane.f32.xlu1 %v458_v8  ;;  %p823_p0 = scmp.lt.s32.totalorder %s620_s12, %s821_s26  ;;  %p824_p1 = scmp.lt.s32.totalorder %s822_s30, %s816_s23 }
  0x1e   : > { %p818_p12 = pnand %p817_p11, %p948_p5 }
  0x1f   : > { %p825_p2 = por %p824_p1, %p823_p0 }
  0x20   : > { %p819_p13 = pneg %p818_p12 }
  0x22   : > { %p826_p3 = pnand %p825_p2, %p819_p13 }
  0x2e   : > { %485 = vperm.xlu1 %787, %v453_v9  }
  0x32   : > { %482 = vperm.xlu0 %786, %v452_v10  }
  0xa1   : > { %v532_v11 = vpop.xlane.xlu0 %531 }
  0xa2   : > { %v980_v12 = vpop.xlane.xlu1 %456  ;;  %v536_v13 = vsub.f32 %v450_v1, %v532_v11  ;;  %v424_v1 = vld [vmem:[%s378_s7 + $0x8] sm:$0xff] }
  0xa3   : > { %v461_v14 = vsub.f32 %v448_v3, %v980_v12 }
  0xa4   : > { %v538_v15 = vmul.f32 0.5, %v536_v13 }
  0xa5   : > { %v463_v16 = vmul.f32 1.442695, %v461_v14  ;;  %v535_v17 = vpop.xlane.xlu0 %534  ;;  %v514_v25 = vmul.f32 0.5, %v461_v14 }
  0xa6   : > { %v983_v18 = vpop.xlane.xlu1 %459  ;;  %v540_v19 = vmul.f32 1.442695, %v538_v15  ;;  %v537_v20 = vsub.f32 %v451_v2, %v535_v17  ;;  %v425_v2 = vsub.f32 %v421_v62, %v423_v0 }
  0xa7   : > { %788 = vpow2.f32 %v463_v16  ;;  %v462_v21 = vsub.f32 %v971_v6, %v983_v18  ;;  %v516_v26 = vmul.f32 1.442695, %v514_v25 }
  0xa8   : > { %790 = vpow2.f32 %v540_v19  ;;  %v539_v22 = vmul.f32 0.5, %v537_v20  ;;  %v431_v4 = vsel %vm419_vm3, %v425_v2, 0.0 }
  0xa9   : > { %v465_v23 = vmul.f32 1.442695, %v462_v21  ;;  %v515_v27 = vmul.f32 0.5, %v462_v21 }
  0xaa   : > { %v542_v24 = vmul.f32 1.442695, %v539_v22  ;;  %v486_v51 = vpop.permute.xlu1 %485 }
  0xab   : > { %792 = vpow2.f32 %v465_v23  ;;  %v518_v28 = vmul.f32 1.442695, %v515_v27  ;;  %vm488_vm2 = vcmp.eq.s32.totalorder %v988_v33, %v486_v51 }
  0xac   : > { %794 = vpow2.f32 %v542_v24  ;;  %v490_v54 = vsel %vm488_vm2, %v971_v6, 0.0  ;;  %v433_v6 = vmul.f32 %v431_v4, %v431_v4 }
  0xad   : > { %796 = vpow2.f32 %v516_v26  ;;  %v483_v34 = vpop.permute.xlu0 %482  ;;  %v494_v58 = vsel %vm454_vm0, %v490_v54, 0.0 }
  0xae   : > { %798 = vpow2.f32 %v518_v28  ;;  %vm487_vm1 = vcmp.eq.s32.totalorder %v988_v33, %v483_v34  ;;  %v436_v8 = vsel %vm435_vm5, %v433_v6, 0.0 }
  0xaf   : > { %v489_v41 = vsel %vm487_vm1, %v448_v3, 0.0  ;;  %v426_v3 = vsub.f32 %v422_v63, %v424_v1 }
  0xb0   : > { %v491_v44 = vsel %vm454_vm0, %v489_v41, 0.0 }
  0xb1   : > { %v432_v5 = vsel %vm420_vm4, %v426_v3, 0.0 }
  0xb2   : > { %v434_v7 = vmul.f32 %v432_v5, %v432_v5 }
  0xb4   : > { %v789_v30 = vpop.eup %788  ;;  %v437_v9 = vsel %vm435_vm5, %v434_v7, 0.0 }
  0xb5   : > { %v791_v31 = vpop.eup %790  ;;  %v467_v36 = vsel %vm454_vm0, %v789_v30, 0.0  ;;  %v438_v10 = vadd.f32 %v437_v9, %v436_v8 }
  0xb6   : > { %v544_v32 = vsel %vm454_vm0, %v791_v31, 0.0  ;;  %v562_v39 = vmul.f32 %v791_v31, %v514_v25  ;;  %v550_v48 = vmul.f32 %v791_v31, %v538_v15 }
  0xb7   : > { %545 = vadd.xlane.f32.xlu1 %v544_v32 }
  0xb8   : > { %v793_v35 = vpop.eup %792  ;;  %v564_v42 = vsel %vm454_vm0, %v562_v39, 0.0  ;;  %v552_v49 = vsel %vm454_vm0, %v550_v48, 0.0 }
  0xb9   : > { %v795_v37 = vpop.eup %794  ;;  %v470_v40 = vsel %vm454_vm0, %v793_v35, 0.0 }
  0xba   : > { %v547_v38 = vsel %vm454_vm0, %v795_v37, 0.0  ;;  %v797_v43 = vpop.eup %796  ;;  %v551_v50 = vmul.f32 %v795_v37, %v539_v22  ;;  %v563_v53 = vmul.f32 %v795_v37, %v515_v27 }
  0xbb   : > { %468 = vadd.xlane.f32.xlu1 %v467_v36  ;;  %548 = vadd.xlane.f32.xlu0 %v547_v38  ;;  %v520_v45 = vsel %vm454_vm0, %v797_v43, 0.0  ;;  %v799_v46 = vpop.eup %798 }
  0xbc   : > { %v523_v47 = vsel %vm454_vm0, %v799_v46, 0.0  ;;  %v555_v52 = vsel %vm454_vm0, %v551_v50, 0.0  ;;  %v567_v56 = vsel %vm454_vm0, %v563_v53, 0.0 }
  0xbf   : > { %471 = vadd.xlane.f32.xlu1 %v470_v40  ;;  %565 = vadd.xlane.f32.xlu0 %v564_v42 }
  0xc3   : > { %521 = vadd.xlane.f32.xlu1 %v520_v45  ;;  %492 = vadd.xlane.f32.xlu0 %v491_v44 }
  0xc7   : > { %524 = vadd.xlane.f32.xlu1 %v523_v47  ;;  %439 = vadd.xlane.f32.xlu0 %v438_v10 }
  0xcb   : > { %553 = vadd.xlane.f32.xlu1 %v552_v49 }
  0xcf   : > { %556 = vadd.xlane.f32.xlu1 %v555_v52 }
  0xd3   : > { %568 = vadd.xlane.f32.xlu1 %v567_v56 }
  0xd7   : > { %495 = vadd.xlane.f32.xlu1 %v494_v58 }
 0x140   : > { %v546_v11 = vpop.xlane.xlu1 %545 }
 0x141   : > { %800 = vlog2.f32 %v546_v11 }
 0x144   : > { %v469_v13 = vpop.xlane.xlu1 %468  ;;  %v549_v14 = vpop.xlane.xlu0 %548 }
 0x145   : > { %802 = vlog2.f32 %v469_v13 }
 0x146   : > { %804 = vrcp.f32 %v546_v11 }
 0x147   : > { %806 = vrcp.f32 %v549_v14 }
 0x148   : > { %v472_v15 = vpop.xlane.xlu1 %471  ;;  %808 = vlog2.f32 %v549_v14  ;;  %v566_v28 = vpop.xlane.xlu0 %565 }
 0x149   : > { %810 = vlog2.f32 %v472_v15 }
 0x14c   : > { %v522_v16 = vpop.xlane.xlu1 %521  ;;  %v493_v38 = vpop.xlane.xlu0 %492 }
 0x14d   : > { %812 = vlog2.f32 %v522_v16 }
 0x14e   : > { %v801_v19 = vpop.eup %800 }
 0x14f   : > { %v573_v25 = vmul.f32 0.6931472, %v801_v19 }
 0x150   : > { %v525_v17 = vpop.xlane.xlu1 %524  ;;  %v440_v0 = vpop.xlane.xlu0 %439 }
 0x151   : > { %814 = vlog2.f32 %v525_v17  ;;  %v441_v1 = vrot.slane %v440_v0, 4 }
 0x152   : > { %v803_v20 = vpop.eup %802 }
 0x153   : > { %v805_v21 = vpop.eup %804  ;;  %v474_v24 = vmul.f32 0.6931472, %v803_v20  ;;  %v442_v2 = vadd.f32 %v441_v1, %v440_v0 }
 0x154   : > { %v554_v22 = vpop.xlane.xlu1 %553  ;;  %v807_v23 = vpop.eup %806  ;;  %v570_v32 = vmul.f32 %v805_v21, %v566_v28 }
 0x155   : > { %v559_v26 = vmul.f32 %v805_v21, %v554_v22  ;;  %v809_v27 = vpop.eup %808  ;;  %v477_v34 = vadd.f32 %v474_v24, %v980_v12  ;;  %v443_v3 = vrot.slane %v442_v2, 2 }
 0x156   : > { %v811_v30 = vpop.eup %810  ;;  %v575_v36 = vmul.f32 0.6931472, %v809_v27 }
 0x157   : > { %v576_v29 = vsub.f32 %v559_v26, %v573_v25  ;;  %v476_v39 = vmul.f32 0.6931472, %v811_v30  ;;  %v497_v43 = vsub.f32 %v477_v34, %v493_v38  ;;  %v444_v60 = vadd.f32 %v443_v3, %v442_v2 }
 0x158   : > { %v557_v31 = vpop.xlane.xlu1 %556 }
 0x159   : > { %v561_v35 = vmul.f32 %v807_v23, %v557_v31  ;;  %v578_v41 = vsub.f32 %v576_v29, %v570_v32  ;;  %v478_v50 = vadd.f32 %v476_v39, %v983_v18  ;;  %v499_v12 = vsel %vm419_vm3, %v497_v43, 0.0 }
 0x15a   : > { %v813_v37 = vpop.eup %812  ;;  %v502_v59 = vsel %vm501_vm6, %v499_v12, 0.0  ;;  %v445_v4 = vrot.slane %v444_v60, 1 }
 0x15b   : > { %v527_v40 = vmul.f32 0.6931472, %v813_v37  ;;  %v577_v44 = vsub.f32 %v561_v35, %v575_v36 }
 0x15c   : > { %v569_v42 = vpop.xlane.xlu1 %568  ;;  %v446_v5 = vadd.f32 %v445_v4, %v444_v60 }
 0x15d   : > { %v571_v45 = vmul.f32 %v807_v23, %v569_v42  ;;  %v580_v46 = vadd.f32 %v578_v41, %v527_v40 }
 0x15e   : > { %v815_v47 = vpop.eup %814  ;;  %740 = vpush %v446_v5 }
 0x15f   : > { %v529_v48 = vmul.f32 0.6931472, %v815_v47  ;;  %v579_v49 = vsub.f32 %v577_v44, %v571_v45  ;;  %v582_v54 = vsel %vm419_vm3, %v580_v46, 0.0 }
 0x160   : > { %v496_v51 = vpop.xlane.xlu1 %495  ;;  %v584_v57 = vsel %vm501_vm6, %v582_v54, 0.0 }
 0x161   : > { %v581_v52 = vadd.f32 %v579_v49, %v529_v48  ;;  %v498_v53 = vsub.f32 %v478_v50, %v496_v51 }
 0x163   : > { %v500_v55 = vsel %vm420_vm4, %v498_v53, 0.0  ;;  %v583_v56 = vsel %vm420_vm4, %v581_v52, 0.0 }
 0x164   : > { %v585_v58 = vsel %vm501_vm6, %v583_v56, 0.0  ;;  %v503_v18 = vsel %vm501_vm6, %v500_v55, 0.0 }
 0x165   : > { %v586_v62 = vadd.f32 %v585_v58, %v584_v57  ;;  %v504_v63 = vadd.f32 %v503_v18, %v502_v59 }
 0x167   : > { %587 = vadd.xlane.f32.xlu0 %v586_v62  ;;  %505 = vadd.xlane.f32.xlu1 %v504_v63 }
 0x18f   : > { %s741_s8 = spop %740 }
 0x190   : > { %v603_v24 = vstv %s741_s8 }
 0x1f0   : > { %v506_v6 = vpop.xlane.xlu1 %505  ;;  %v588_v61 = vpop.xlane.xlu0 %587 }
 0x1f1   : > { %v507_v7 = vrot.slane %v506_v6, 4  ;;  %v589_v8 = vrot.slane %v588_v61, 4 }
 0x1f3   : > { %v508_v9 = vadd.f32 %v507_v7, %v506_v6  ;;  %v590_v10 = vadd.f32 %v589_v8, %v588_v61 }
 0x1f5   : > { %v509_v11 = vrot.slane %v508_v9, 2  ;;  %v591_v13 = vrot.slane %v590_v10, 2 }
 0x1f7   : > { %v510_v14 = vadd.f32 %v509_v11, %v508_v9  ;;  %v592_v15 = vadd.f32 %v591_v13, %v590_v10 }
 0x1f9   : > { %v511_v16 = vrot.slane %v510_v14, 1  ;;  %v593_v17 = vrot.slane %v592_v15, 1 }
 0x1fb   : > { %v512_v19 = vadd.f32 %v511_v16, %v510_v14  ;;  %v594_v20 = vadd.f32 %v593_v17, %v592_v15 }
 0x1fd   : > { %742 = vpush %v512_v19 }
 0x1fe   : > { %744 = vpush %v594_v20 }
 0x22e   : > { %s743_s9 = spop %742 }
 0x22f   : > { %v601_v21 = vstv %s743_s9  ;;  %s745_s10 = spop %744 }
 0x230   : > { %v599_v22 = vstv %s745_s10 }
 0x231   : > { %v600_v23 = vsel %vm598_vm7, %v599_v22, 0.0 }
 0x232   : > { %v602_v25 = vsel %vm597_vm8, %v601_v21, %v600_v23 }
 0x233   : > { %v604_v26 = vsel %vm596_vm9, %v603_v24, %v602_v25 }
 0x234   : > { %605 = vst [vmem:[%s341_s11] sm:$0x1] %v604_v26 }
 0x235   : > { %829 = shalt.err (!%p826_p3)
}
 0x236   : > { %s830_s22 = scalar_lea.hbm %s1044_s15, 16  ;;  %s834_s6 = scalar_lea.hbm %s1084_s5, 32 }
 0x237   : > { %p831_p4 = scmp.ne.s32.totalorder %s1044_s15, %s830_s22  ;;  %p835_p9 = scmp.lt.s32.totalorder %s1044_s15, %s1084_s5 }
 0x238   : > { %p836_p10 = scmp.lt.s32.totalorder %s834_s6, %s830_s22 }
 0x239   : > { %p832_p7 = pnand %p831_p4, %p948_p5 }
 0x23a   : > { %p837_p11 = por %p836_p10, %p835_p9 }
 0x23b   : > { %p833_p8 = pneg %p832_p7 }
 0x23d   : > { %p838_p12 = pnand %p837_p11, %p833_p8 }
 0x23f   : > { %841 = shalt.err (!%p838_p12)
}
 0x240   : > { %746 = dma.vmem_to_hbm [thread:$0]  (%p948_p5), %s620_s12, 16, %s1044_s15, %s607_s17  }
 0x241 PF: > { %p752_p13 = scmp.ge.s32.totalorder %s876_s21, 2  ;;  %s631_s10 = sand.u32 1, %s864_s18  }
 0x242   : > { %s632_s11 = scalar_lea.sflag [#allocation3], %s631_s10 }
 0x243   : > { %p749_p0 = pnand %p752_p13, %p952_p6 }
 0x245   : > { %p750_p1 = pneg %p749_p0 }
 0x247   : > { %859 = dma.done.wait (%p750_p1), %s632_s11, 16  }
 0x248   : > { %861 = vsyncadd (%p750_p1), %s632_s11, 4294967280  ;;  %p15_p2 = scmp.ge.s32.totalorder %s935_s24, 4   ;;  %s1087_s18 = smov %s868_s19 }
 0x249   : > { %s1088_s19 = smov %s872_s20  ;;  %s1089_s20 = smov %s946_s27 }
 0x24a   : > { %s1090_s21 = smov %s935_s24  ;;  %17 = sbr.rel (!%p15_p2) target bundleno = 3 (0x3), region = 87 }
 0x24f   :  { %636 = vsyncpa [#allocation3], 1 }
 0x250   :  { %638 = vsyncpa [#allocation3 + $0x1], 1 }

</bundles_post_ra>
